<compile_context>
chip_gen: v6e
topology: v6e:2x2x1
jax: 0.10.0
libtpu: 0.0.40
codegen_flags: <defaults>
</compile_context>

<pallas_src>
import functools

import jax
import jax.numpy as jnp
from jax import lax
from jax.experimental import pallas as pl
from jax.experimental.pallas import tpu as pltpu

LN_EPS = 1e-5  # PyTorch nn.LayerNorm default


def _round_up(x, m):
    return ((x + m - 1) // m) * m


def _cdiv(a, b):
    return (a + b - 1) // b


# ---------------------------------------------------------------------------
# Kernel: one M row-tile -> matmul (bf16 operands, f32 MXU acc) + bias + LayerNorm
# ---------------------------------------------------------------------------
def _patch_embed_kernel(patches_ref, w_ref, pgb_ref, out_ref):
    # patches: (TM, Kdim) compute_dtype   w: (Kdim, E) compute_dtype
    # pgb: (8, E) f32, rows 0/1/2 = bias / gamma / beta   out: (TM, E)
    y = jnp.dot(patches_ref[...], w_ref[...], preferred_element_type=jnp.float32)
    pgb = pgb_ref[...]
    y = y + pgb[0:1, :]                                   # conv bias
    # LayerNorm over the true embed dim (no pad columns exist).
    mean = jnp.mean(y, axis=-1, keepdims=True)
    yc = y - mean
    var = jnp.mean(yc * yc, axis=-1, keepdims=True)       # centered two-pass variance
    y = yc * lax.rsqrt(var + LN_EPS)
    out_ref[...] = (y * pgb[1:2, :] + pgb[2:3, :]).astype(out_ref.dtype)


# ---------------------------------------------------------------------------
# One-time parameter re-layout (hoist out of the per-forward call)
# ---------------------------------------------------------------------------
def prepare_patch_embed_params(conv_w, conv_b, gamma, beta,
                               compute_dtype=jnp.bfloat16):
    """conv_w: (E, Cin, K, K) -> w_mat: (K*K*Cin, E) matching (kh, kw, cin) patch order.
    Returns (w_mat, pgb) where pgb is an (8, E) f32 pack of bias/gamma/beta."""
    embed_dim, cin, k, _ = conv_w.shape
    w_mat = jnp.transpose(conv_w, (2, 3, 1, 0)).reshape(k * k * cin, embed_dim)
    w_mat = w_mat.astype(compute_dtype)
    pgb = jnp.zeros((8, embed_dim), jnp.float32)
    pgb = pgb.at[0].set(conv_b.astype(jnp.float32))
    pgb = pgb.at[1].set(gamma.astype(jnp.float32))
    pgb = pgb.at[2].set(beta.astype(jnp.float32))
    return w_mat, pgb


# ---------------------------------------------------------------------------
# Forward pass with pre-prepared parameters
# ---------------------------------------------------------------------------
def patch_embedding_apply(x, w_mat, pgb, *, kernel_size, stride=4, padding=3,
                          out_dtype=None, tm_max=2048):
    """x: (B, Cin, H, W) NCHW.  Returns ((B, Hout*Wout, E), (Hout, Wout))."""
    B, Cin, H, W = x.shape
    K = kernel_size
    Kdim, embed_dim = w_mat.shape
    assert Kdim == K * K * Cin, "weight layout does not match x channels / kernel size"
    compute_dtype = w_mat.dtype
    out_dtype = x.dtype if out_dtype is None else out_dtype

    Hout = (H + 2 * padding - K) // stride + 1
    Wout = (W + 2 * padding - K) // stride + 1
    M = B * Hout * Wout

    # --- im2col glue (XLA): bf16 before pad, built directly in (kh, kw, cin)
    #     minor order at the TRUE K*K*Cin width (no K-pad inflation in HBM).
    x_nhwc = jnp.transpose(x, (0, 2, 3, 1)).astype(compute_dtype)      # (B,H,W,Cin)
    x_pad = jnp.pad(x_nhwc,
                    ((0, 0), (padding, padding), (padding, padding), (0, 0)))
    cols = [x_pad[:, kh:kh + stride * Hout:stride,
                  kw:kw + stride * Wout:stride, :]
            for kh in range(K) for kw in range(K)]
    patches = jnp.concatenate(cols, axis=-1).reshape(M, Kdim)

    # --- M tiling: large tiles, but keep >= 2 grid steps (v7x has 2 TCs and the
    #     grid axis is "parallel"); TM stays a multiple of 8 (sublane).
    TM = min(_round_up(tm_max, 8), max(8, _round_up(_cdiv(M, 2), 8)))
    M_pad = _round_up(M, TM)
    if M_pad > M:
        # Padded rows produce y = beta after LN (var clamped by eps); sliced away.
        patches = jnp.pad(patches, ((0, M_pad - M), (0, 0)))

    # --- VMEM budget: only raise the scoped limit when a big TM needs it
    #     (v5e default scoped VMEM is 16 MiB; v6e/v7x default 32 MiB).
    cd_sz = jnp.dtype(compute_dtype).itemsize
    out_sz = jnp.dtype(out_dtype).itemsize
    vmem_est = (2 * TM * Kdim * cd_sz            # double-buffered patch row-tile
                + 2 * Kdim * embed_dim * cd_sz   # resident weights
                + 2 * 8 * embed_dim * 4          # packed bias/gamma/beta
                + 2 * TM * embed_dim * out_sz)   # double-buffered output tile
    cp_kwargs = dict(dimension_semantics=("parallel",))
    if vmem_est > 12 * 1024 * 1024:
        cp_kwargs["vmem_limit_bytes"] = min(2 * vmem_est, 48 * 1024 * 1024)

    out = pl.pallas_call(
        _patch_embed_kernel,
        out_shape=jax.ShapeDtypeStruct((M_pad, embed_dim), out_dtype),
        grid=(M_pad // TM,),
        in_specs=[
            pl.BlockSpec((TM, Kdim), lambda i: (i, 0)),          # streamed row-tile
            pl.BlockSpec((Kdim, embed_dim), lambda i: (0, 0)),   # resident weight
            pl.BlockSpec((8, embed_dim), lambda i: (0, 0)),      # bias/gamma/beta pack
        ],
        out_specs=pl.BlockSpec((TM, embed_dim), lambda i: (i, 0)),
        compiler_params=pltpu.CompilerParams(**cp_kwargs),
    )(patches, w_mat, pgb)

    if M_pad > M:
        out = out[:M]                                  # rows only; no lane depad pass
    out = out.reshape(B, Hout * Wout, embed_dim)
    return out, (Hout, Wout)


# Convenience wrapper mirroring the PyTorch module's signature.
def patch_embedding(x, conv_w, conv_b, gamma, beta, *, stride=4, padding=3,
                    compute_dtype=jnp.bfloat16, out_dtype=None, tm_max=2048):
    w_mat, pgb = prepare_patch_embed_params(conv_w, conv_b, gamma, beta,
                                            compute_dtype=compute_dtype)
    return patch_embedding_apply(x, w_mat, pgb, kernel_size=conv_w.shape[-1],
                                 stride=stride, padding=padding,
                                 out_dtype=out_dtype, tm_max=tm_max)


# ---------------------------------------------------------------------------
# Plain-JAX f32 reference mirroring the PyTorch forward (for verification)
# ---------------------------------------------------------------------------
def _reference(x, conv_w, conv_b, gamma, beta, *, stride=4, padding=3):
    y = lax.conv_general_dilated(
        x, conv_w, window_strides=(stride, stride),
        padding=[(padding, padding), (padding, padding)],
        dimension_numbers=("NCHW", "OIHW", "NCHW"))
    y = y + conv_b[None, :, None, None]
    B, C, Hout, Wout = y.shape
    y = y.reshape(B, C, Hout * Wout).transpose(0, 2, 1)            # (B, L, C)
    mean = jnp.mean(y, axis=-1, keepdims=True)
    var = jnp.mean((y - mean) ** 2, axis=-1, keepdims=True)
    y = (y - mean) * lax.rsqrt(var + LN_EPS) * gamma + beta
    return y, (Hout, Wout)


if __name__ == "__main__":
    key = jax.random.PRNGKey(0)
    B, Cin, H, W = 2, 4, 16, 16
    embed_dim, K = 32, 7
    stride, padding = 4, 3

    k_x, k_w, k_b = jax.random.split(key, 3)
    x = jax.random.normal(k_x, (B, Cin, H, W), dtype=jnp.float32)
    conv_w = 0.05 * jax.random.normal(k_w, (embed_dim, Cin, K, K), dtype=jnp.float32)
    conv_b = 0.05 * jax.random.normal(k_b, (embed_dim,), dtype=jnp.float32)
    gamma = jnp.ones((embed_dim,), dtype=jnp.float32)
    beta = jnp.zeros((embed_dim,), dtype=jnp.float32)

    Hout = (H + 2 * padding - K) // stride + 1
    Wout = (W + 2 * padding - K) // stride + 1

    # One-time parameter re-layout, hoisted out of the forward pass.
    w_mat, pgb = prepare_patch_embed_params(conv_w, conv_b, gamma, beta)

    fwd = jax.jit(functools.partial(
        lambda xx, ww, pp: patch_embedding_apply(
            xx, ww, pp, kernel_size=K, stride=stride, padding=padding)[0]))
    out = jax.block_until_ready(fwd(x, w_mat, pgb))

    ref, (Hr, Wr) = _reference(x, conv_w, conv_b, gamma, beta,
                               stride=stride, padding=padding)
    assert out.shape == (B, Hout * Wout, embed_dim)
    assert (Hout, Wout) == (Hr, Wr) == (4, 4)
    # bf16 MXU operands (f32 accumulation + f32 LayerNorm) vs f32 reference.
    assert jnp.allclose(out, ref, atol=3e-2, rtol=3e-2)

    print("KERNEL_OK")
</pallas_src>

<mosaic_0001>
module attributes {stable_mosaic.version = 11 : i64} {
  func.func @_patch_embed_kernel(%arg0: i32, %arg1: memref<16x196xbf16, #tpu.memory_space<vmem>>, %arg2: memref<196x32xbf16, #tpu.memory_space<vmem>>, %arg3: memref<8x32xf32, #tpu.memory_space<vmem>>, %arg4: memref<16x32xf32, #tpu.memory_space<vmem>>) attributes {dimension_semantics = [#tpu.dimension_semantics<parallel>], iteration_bounds = array<i64: 2>, scalar_prefetch = 0 : i64, scratch_operands = 0 : i64, tpu.core_type = #tpu.core_type<tc>, window_params = [{transform_indices = @transform_0, window_bounds = array<i64: 16, 196>}, {pipeline_mode = #tpu.pipeline_mode<synchronous>, transform_indices = @transform_1, window_bounds = array<i64: 196, 32>}, {pipeline_mode = #tpu.pipeline_mode<synchronous>, transform_indices = @transform_2, window_bounds = array<i64: 8, 32>}, {transform_indices = @transform_3, window_bounds = array<i64: 16, 32>}]} {
    %c0 = arith.constant 0 : index
    %c0_0 = arith.constant 0 : index
    %0 = vector.load %arg1[%c0, %c0_0] : memref<16x196xbf16, #tpu.memory_space<vmem>>, vector<16x196xbf16>
    %c0_1 = arith.constant 0 : index
    %c0_2 = arith.constant 0 : index
    %1 = vector.load %arg2[%c0_1, %c0_2] : memref<196x32xbf16, #tpu.memory_space<vmem>>, vector<196x32xbf16>
    %cst = arith.constant dense<0.000000e+00> : vector<16x32xf32>
    %2 = tpu.matmul %0, %1, %cst {dimension_numbers = #tpu.dot_dimension_numbers<[1], [0], [0], [1], [0, 0, 1, 1], [], []>} : vector<16x196xbf16>, vector<196x32xbf16>, vector<16x32xf32> -> vector<16x32xf32>
    %c0_3 = arith.constant 0 : index
    %c0_4 = arith.constant 0 : index
    %3 = vector.load %arg3[%c0_3, %c0_4] : memref<8x32xf32, #tpu.memory_space<vmem>>, vector<8x32xf32>
    %4 = vector.extract_strided_slice %3 {offsets = [0, 0], sizes = [1, 32], strides = [1, 1]} : vector<8x32xf32> to vector<1x32xf32>
    %5 = vector.broadcast %4 : vector<1x32xf32> to vector<16x32xf32>
    %6 = arith.addf %2, %5 : vector<16x32xf32>
    %cst_5 = arith.constant dense<0.000000e+00> : vector<16xf32>
    %7 = vector.multi_reduction <add>, %6, %cst_5 [1] : vector<16x32xf32> to vector<16xf32>
    %8 = vector.shape_cast %7 : vector<16xf32> to vector<16x1xf32>
    %cst_6 = arith.constant 3.200000e+01 : f32
    %9 = vector.broadcast %cst_6 : f32 to vector<16x1xf32>
    %10 = arith.divf %8, %9 : vector<16x1xf32>
    %11 = vector.broadcast %10 : vector<16x1xf32> to vector<16x32xf32>
    %12 = arith.subf %6, %11 : vector<16x32xf32>
    %13 = arith.mulf %12, %12 : vector<16x32xf32>
    %cst_7 = arith.constant dense<0.000000e+00> : vector<16xf32>
    %14 = vector.multi_reduction <add>, %13, %cst_7 [1] : vector<16x32xf32> to vector<16xf32>
    %15 = vector.shape_cast %14 : vector<16xf32> to vector<16x1xf32>
    %cst_8 = arith.constant 3.200000e+01 : f32
    %16 = vector.broadcast %cst_8 : f32 to vector<16x1xf32>
    %17 = arith.divf %15, %16 : vector<16x1xf32>
    %cst_9 = arith.constant 9.99999974E-6 : f32
    %18 = vector.broadcast %cst_9 : f32 to vector<16x1xf32>
    %19 = arith.addf %17, %18 : vector<16x1xf32>
    %20 = math.rsqrt %19 : vector<16x1xf32>
    %21 = vector.broadcast %20 : vector<16x1xf32> to vector<16x32xf32>
    %22 = arith.mulf %12, %21 : vector<16x32xf32>
    %23 = vector.extract_strided_slice %3 {offsets = [1, 0], sizes = [1, 32], strides = [1, 1]} : vector<8x32xf32> to vector<1x32xf32>
    %24 = vector.broadcast %23 : vector<1x32xf32> to vector<16x32xf32>
    %25 = arith.mulf %22, %24 : vector<16x32xf32>
    %26 = vector.extract_strided_slice %3 {offsets = [2, 0], sizes = [1, 32], strides = [1, 1]} : vector<8x32xf32> to vector<1x32xf32>
    %27 = vector.broadcast %26 : vector<1x32xf32> to vector<16x32xf32>
    %28 = arith.addf %25, %27 : vector<16x32xf32>
    %c0_10 = arith.constant 0 : index
    %c0_11 = arith.constant 0 : index
    %29 = vector.load %arg4[%c0_10, %c0_11] : memref<16x32xf32, #tpu.memory_space<vmem>>, vector<16x32xf32>
    tpu.vector_store %arg4[%c0_10, %c0_11], %28 {strides = array<i32>} : memref<16x32xf32, #tpu.memory_space<vmem>>, vector<16x32xf32>,
    return
  }
  func.func @transform_0(%arg0: i32) -> (i32, i32) {
    %c0_i32 = arith.constant 0 : i32
    %c0_i32_0 = arith.constant 0 : i32
    return %arg0, %c0_i32 : i32, i32
  }
  func.func @transform_1(%arg0: i32) -> (i32, i32) {
    %c0_i32 = arith.constant 0 : i32
    %c0_i32_0 = arith.constant 0 : i32
    %c0_i32_1 = arith.constant 0 : i32
    return %c0_i32, %c0_i32_0 : i32, i32
  }
  func.func @transform_2(%arg0: i32) -> (i32, i32) {
    %c0_i32 = arith.constant 0 : i32
    %c0_i32_0 = arith.constant 0 : i32
    %c0_i32_1 = arith.constant 0 : i32
    return %c0_i32, %c0_i32_0 : i32, i32
  }
  func.func @transform_3(%arg0: i32) -> (i32, i32) {
    %c0_i32 = arith.constant 0 : i32
    %c0_i32_0 = arith.constant 0 : i32
    return %arg0, %c0_i32 : i32, i32
  }
}

</mosaic_0001>

<bundles_post_ra>
// kernel: _lambda_.1
= control target key start
LH: loop header
LB: loop body
LE: loop exit
PB: predicated region body
PF: predicated region fallthrough
CT: control target
= control target key end

     0   :  { %8 = vsyncpa [#allocation3], 0  ;;  %s791_s0 = inlined_call_operand.vmem [shape: bf16[32,196], index: 0, kind: input, shape index: {}]   ;;  %s792_s1 = inlined_call_operand.vmem [shape: bf16[196,32], index: 1, kind: input, shape index: {}]   ;;  %s793_s2 = inlined_call_operand.vmem [shape: f32[8,32], index: 2, kind: input, shape index: {}]   ;;  %s794_s3 = inlined_call_operand.hbm [shape: f32[32,32], index: 3, kind: output, shape index: {}]  }
   0x1   :  { %10 = vsyncpa [#allocation3 + $0x1], 0  ;;  %s638_s12 = smov 0   ;;  %s640_s13 = smov 0  }
   0x2   :  { %s642_s14 = smov 0   ;;  %s644_s15 = smov 0  }
   0x3 LB: > { %s659_s16 = sadd.s32 4294967295, %s612_s15   ;;  %s459_s17 = sadd.s32 4294967294, %s612_s15   ;;  %s612_s15 = sphi %s644_s15, %s800_s15   ;;  %s608_s14 = sphi %s642_s14, %s799_s14   ;;  %s604_s13 = sphi %s640_s13, %s798_s13   ;;  %s600_s12 = sphi %s638_s12, %s797_s12  }
   0x4   : > { %s663_s18 = sadd.s32 1, %s612_s15   ;;  %s91_s19 = sadd.s32 1, %s608_s14 }
   0x5   : > { %s88_s20 = ssub.s32 %s612_s15, %s663_s18  ;;  %p101_p0 = scmp.ne.s32.totalorder %s608_s14, %s604_s13 }
   0x6   : > { %p89_p1 = scmp.eq.s32.totalorder %s88_s20, 0  ;;  %p102_p2 = scmp.eq.s32.totalorder %s659_s16, 1 }
   0x7   : > { %p107_p3 = scmp.ne.s32.totalorder %s604_s13, %s600_s12  ;;  %p108_p4 = scmp.eq.s32.totalorder %s459_s17, 1 }
   0x8   : > { %s674_s21 = scalar_select %p89_p1, %s608_s14, %s91_s19  }
   0x9   : > { %p676_p5 = por %p102_p2, %p101_p0  ;;  %p680_p6 = por %p108_p4, %p107_p3 }
   0xa   : > { %p462_p7 = scmp.ge.s32.totalorder %s612_s15, 1  ;;  %p142_p8 = scmp.lt.s32.totalorder %s612_s15, 3 }
   0xc   : > { %p143_p9 = pnand %p462_p7, %p142_p8 }
   0xd   : > { %s464_s28 = sshll.u32 (!%p143_p9), %s659_s16, 1  ;;  %s489_s20 = sshll.u32 (!%p143_p9), %s659_s16, 8 }
   0xe   : > { %146 = sbr.rel (%p143_p9) target bundleno = 593 (0x251), region = 32  ;;  %p168_p10 = scmp.lt.s32.totalorder (!%p143_p9), %s464_s28, 3 }
   0xf   : > { %s615_s30 = smov (!%p143_p9), [#allocation2]  }
  0x13   : > { %v532_v0 = vld [vmem:[%s792_s1 + $0x38] sm:$0xff]   ;;  %v614_v1 = vmov 0   ;;  %v533_v2 = vld [vmem:[%s792_s1 + $0x30] sm:$0xff]   ;;  %s802_s28 = smov (!%p168_p10, %s464_s28), 3  ;;  %v534_v3 = vld [vmem:[%s792_s1 + $0x28] sm:$0xff]   ;;  %vm292_vm0 = vcmask 556032   ;;  %v204_v17 = vlaneseq }
  0x14   : > { %300 = vmatprep.subr.bf16.mxu0 %v614_v1  ;;  %s488_s4 = sshll.u32 %s802_s28, 3  ;;  %v535_v4 = vld [vmem:[%s792_s1 + $0x20] sm:$0xff]   ;;  %v536_v6 = vld [vmem:[%s792_s1 + $0x18] sm:$0xff]   ;;  %v537_v7 = vld [vmem:[%s792_s1 + $0x10] sm:$0xff]   ;;  %vm296_vm1 = vcmask 1041408   ;;  %vm341_vm2 = vcmask 261120   ;;  %s746_s28 = scalar_lea.hbm %s794_s3, %s489_s20 }
  0x15   : > { %301 = vmatpush1.bf16.msra.mxu0 %v532_v0  ;;  %s702_s9 = scalar_lea.vmem %s791_s0, %s488_s4  ;;  %v538_v8 = vld [vmem:[%s792_s1 + $0x8] sm:$0xff]   ;;  %v539_v9 = vld [vmem:[%s792_s1] sm:$0xff]   ;;  %v541_v12 = vld [vmem:[%s792_s1 + $0x58] sm:$0xff]   ;;  %v205_v18 = vshrl.u32 %v204_v17, 7  ;;  %s556_s4 = sshll.u32 %s615_s30, 4  ;;  %s557_s4 = int_to_ptr.vmem [resolvable:$false] %s556_s4 }
  0x16   : > { %302 = vmatprep.subr.bf16.mxu0 %v614_v1  ;;  %v547_v5 = vld [vmem:[%s702_s9 + $0x4] ss:$8 sps:$4 sm:$0xff]   ;;  %v540_v10 = vld [vmem:[%s792_s1 + $0x60] ss:$0 sps:$4 sm:$0x33]   ;;  %v542_v13 = vld [vmem:[%s792_s1 + $0x50] sm:$0xff]  }
  0x17   : > { %482 = vmatprep.mubr.msk.bf16.mxu0 %vm292_vm0, %v547_v5  ;;  %v298_v11 = vsel %vm296_vm1, %v540_v10, 0  ;;  %v543_v14 = vld [vmem:[%s792_s1 + $0x48] sm:$0xff]   ;;  %v544_v15 = vld [vmem:[%s792_s1 + $0x40] sm:$0xff]   ;;  %v206_v19 = vsub.s32 0, %v205_v18  ;;  %v371_v46 = vsub.s32 1, %v205_v18  ;;  %v377_v47 = vsub.s32 2, %v205_v18 }
  0x18   : > { %v545_v16 = vld [vmem:[%s702_s9] ss:$8 sps:$4 sm:$0xff]   ;;  %s164_s9 = sand.u32 1, %s604_s13   ;;  %s558_s5 = scalar_lea.vmem %s557_s4, 512 }
  0x19   : > { %303 = vmatpush1.bf16.msra.mxu0 %v533_v2  ;;  %v203_v20 = vld [vmem:[%s793_s2] sm:$0xff]  ;;  %s463_s19 = sshll.u32 %s164_s9, 4  ;;  %s751_s29 = scalar_lea.sflag [#allocation3], %s164_s9 }
  0x1a   : > { %304 = vmatprep.subr.bf16.mxu0 %v614_v1  ;;  %v207_v21 = vrot.slane %v203_v20, %v206_v19  ;;  %v372_v48 = vrot.slane %v203_v20, %v371_v46  ;;  %v378_v50 = vrot.slane %v203_v20, %v377_v47  ;;  %s166_s24 = scalar_lea.vmem [#allocation2], %s463_s19 }
  0x1b   : > { %s397_s25 = sshll.u32 %s166_s24, 4  ;;  %s748_s25 = int_to_ptr.vmem [resolvable:$true] %s397_s25 }
  0x1c   : > { %s552_s16 = scalar_lea.vmem %s748_s25, 256  ;;  %p559_p0 = scmp.lt.s32.totalorder %s748_s25, %s557_s4 }
  0x1d   : > { %305 = vmatpush1.bf16.msra.mxu0 %v534_v3  ;;  %p553_p11 = scmp.ne.s32.totalorder %s748_s25, %s552_s16  ;;  %p560_p1 = scmp.lt.s32.totalorder %s558_s5, %s552_s16 }
  0x1e   : > { %306 = vmatprep.subr.bf16.mxu0 %v614_v1 }
  0x1f   : > { %p554_p12 = pnand %p553_p11, %p676_p5  ;;  %p561_p2 = por %p560_p1, %p559_p0 }
  0x21   : > { %307 = vmatpush1.bf16.msra.mxu0 %v535_v4  ;;  %p555_p13 = pneg %p554_p12 }
  0x22   : > { %308 = vmatprep.subr.bf16.mxu0 %v614_v1 }
  0x23   : > { %p562_p3 = pnand %p561_p2, %p555_p13 }
  0x25   : > { %309 = vmatpush1.bf16.msra.mxu0 %v536_v6 }
  0x26   : > { %310 = vmatprep.subr.bf16.mxu0 %v614_v1 }
  0x29   : > { %311 = vmatpush1.bf16.msra.mxu0 %v537_v7 }
  0x2a   : > { %312 = vmatprep.subr.bf16.mxu0 %v614_v1 }
  0x2d   : > { %313 = vmatpush1.bf16.msra.mxu0 %v538_v8 }
  0x2e   : > { %314 = vmatprep.subr.bf16.mxu0 %v614_v1 }
  0x31   : > { %315 = vmatpush1.bf16.msra.mxu0 %v539_v9 }
  0x32   : > { %322 = vmatprep.subr.bf16.mxu0 %v614_v1 }
  0x35   : > { %323 = vmatpush2.bf16.msra.mxu0 %v298_v11 }
  0x36   : > { %324 = vmatprep.subr.bf16.mxu0 %v614_v1 }
  0x39   : > { %325 = vmatpush2.bf16.msra.mxu0 %v541_v12 }
  0x3a   : > { %326 = vmatprep.subr.bf16.mxu0 %v614_v1 }
  0x3d   : > { %327 = vmatpush2.bf16.msra.mxu0 %v542_v13 }
  0x3e   : > { %328 = vmatprep.subr.bf16.mxu0 %v614_v1 }
  0x41   : > { %329 = vmatpush2.bf16.msra.mxu0 %v543_v14 }
  0x42   : > { %330 = vmatprep.subr.bf16.mxu0 %v614_v1 }
  0x45   : > { %331 = vmatpush2.bf16.msra.mxu0 %v544_v15 }
  0x48   : > { %333 = vmatmul.mubr.bf16.vlgmr.msra.gmra.mxu0 %v545_v16 }
 0x108   : > { %v334_v22 = vpop.f32.mrf.mxu0 }
 0x109   : > { %v335_v23 = vadd.f32 %v334_v22, %v207_v21 }
 0x10a   : > { %v336_v24 = vpop.f32.mrf.mxu0 }
 0x10b   : > { %v342_v25 = vsel %vm341_vm2, %v335_v23, 0.0 }
 0x10c   : > { %v337_v26 = vpop.f32.mrf.mxu0  ;;  %343 = vadd.xlane.f32.xlu0 %v342_v25 }
 0x10d   : > { %v338_v27 = vadd.f32 %v337_v26, %v207_v21 }
 0x10e   : > { %v339_v28 = vpop.f32.mrf.mxu0 }
 0x10f   : > { %v345_v29 = vsel %vm341_vm2, %v338_v27, 0.0 }
 0x110   : > { %346 = vadd.xlane.f32.xlu0 %v345_v29 }
 0x195   : > { %v344_v30 = vpop.xlane.xlu0 %343 }
 0x196   : > { %v349_v31 = vmul.f32 0.03125, %v344_v30 }
 0x198   : > { %v351_v32 = vsub.f32 %v335_v23, %v349_v31 }
 0x199   : > { %v347_v33 = vpop.xlane.xlu0 %346 }
 0x19a   : > { %v350_v34 = vmul.f32 0.03125, %v347_v33  ;;  %v353_v35 = vmul.f32 %v351_v32, %v351_v32 }
 0x19c   : > { %v352_v36 = vsub.f32 %v338_v27, %v350_v34  ;;  %v355_v37 = vsel %vm341_vm2, %v353_v35, 0.0 }
 0x19d   : > { %356 = vadd.xlane.f32.xlu1 %v355_v37 }
 0x19e   : > { %v354_v38 = vmul.f32 %v352_v36, %v352_v36 }
 0x1a0   : > { %v358_v39 = vsel %vm341_vm2, %v354_v38, 0.0 }
 0x1a1   : > { %359 = vadd.xlane.f32.xlu1 %v358_v39 }
 0x226   : > { %v357_v40 = vpop.xlane.xlu1 %356 }
 0x227   : > { %v361_v41 = vmul.f32 0.03125, %v357_v40 }
 0x229   : > { %v363_v42 = vadd.f32 1e-05, %v361_v41 }
 0x22a   : > { %v360_v43 = vpop.xlane.xlu1 %359 }
 0x22b   : > { %548 = vrsqrt.f32 %v363_v42  ;;  %v362_v44 = vmul.f32 0.03125, %v360_v43 }
 0x22d   : > { %v364_v45 = vadd.f32 1e-05, %v362_v44 }
 0x22f   : > { %550 = vrsqrt.f32 %v364_v45 }
 0x238   : > { %v549_v49 = vpop.eup %548 }
 0x239   : > { %v367_v51 = vmul.f32 %v549_v49, %v351_v32 }
 0x23b   : > { %v373_v52 = vmul.f32 %v372_v48, %v367_v51 }
 0x23c   : > { %v551_v53 = vpop.eup %550 }
 0x23d   : > { %v368_v54 = vmul.f32 %v551_v53, %v352_v36  ;;  %v379_v55 = vadd.f32 %v378_v50, %v373_v52 }
 0x23f   : > { %v374_v56 = vmul.f32 %v372_v48, %v368_v54  ;;  %381 = vst.msk [vmem:[%s166_s24] sm:$0xff] %vm341_vm2, %v379_v55 }
 0x241   : > { %v380_v57 = vadd.f32 %v378_v50, %v374_v56 }
 0x243   : > { %382 = vst.msk [vmem:[%s166_s24 + $0x8] sm:$0xff] %vm341_vm2, %v380_v57 }
 0x244   : > { %565 = shalt.err (!%p562_p3)
}
 0x245   : > { %s566_s6 = scalar_lea.hbm %s746_s28, 256  ;;  %s570_s10 = scalar_lea.hbm %s794_s3, 512 }
 0x246   : > { %p567_p4 = scmp.ne.s32.totalorder %s746_s28, %s566_s6  ;;  %p571_p9 = scmp.lt.s32.totalorder %s746_s28, %s794_s3 }
 0x247   : > { %p572_p10 = scmp.lt.s32.totalorder %s570_s10, %s566_s6 }
 0x248   : > { %p568_p7 = pnand %p567_p4, %p676_p5 }
 0x249   : > { %p573_p11 = por %p572_p10, %p571_p9 }
 0x24a   : > { %p569_p8 = pneg %p568_p7 }
 0x24c   : > { %p574_p12 = pnand %p573_p11, %p569_p8 }
 0x24e   : > { %577 = shalt.err (!%p574_p12)
}
 0x24f   : > { %s616_s9 = smov 128   ;;  %s617_s19 = smov 8  }
 0x250   : > { %490 = dma.vmem_to_hbm [thread:$0]  (%p676_p5), %s748_s25, 256, %s746_s28, %s751_s29, %s616_s9, %s616_s9, %s617_s19  }
 0x251 PF: > { %p496_p13 = scmp.ge.s32.totalorder %s612_s15, 2  ;;  %s412_s20 = sand.u32 1, %s600_s12  }
 0x252   : > { %s413_s24 = scalar_lea.sflag [#allocation3], %s412_s20 }
 0x253   : > { %p493_p0 = pnand %p496_p13, %p680_p6 }
 0x255   : > { %p494_p1 = pneg %p493_p0 }
 0x257   : > { %595 = dma.done.wait (%p494_p1), %s413_s24, 256  }
 0x258   : > { %597 = vsyncadd (%p494_p1), %s413_s24, 4294967040  ;;  %p13_p2 = scmp.ge.s32.totalorder %s663_s18, 4   ;;  %s797_s12 = smov %s604_s13 }
 0x259   : > { %s798_s13 = smov %s608_s14  ;;  %s799_s14 = smov %s674_s21 }
 0x25a   : > { %s800_s15 = smov %s663_s18  ;;  %15 = sbr.rel (!%p13_p2) target bundleno = 3 (0x3), region = 67 }
 0x25f   :  { %418 = vsyncpa [#allocation3], 1 }
 0x260   :  { %420 = vsyncpa [#allocation3 + $0x1], 1 }

</bundles_post_ra>
